<compile_context>
chip_gen: v6e
topology: v6e:2x2x1
jax: 0.10.0
libtpu: 0.0.40
codegen_flags: <defaults>
</compile_context>

<pallas_src>
import functools

import jax
import jax.numpy as jnp
from jax.experimental import pallas as pl
from jax.experimental.pallas import tpu as pltpu

_PAD = 128  # lane-aligned packed width for every layer's output columns


def _round8(n):
    return ((n + 7) // 8) * 8


def _round16(n):
    # input rows rounded to 16 so every bf16 weight-slab slice start/length is
    # sublane-pack aligned (bf16 packs 2 rows per sublane).
    return ((n + 15) // 16) * 16


def _mlp_action_kernel(x_ref, w_ref, b_ref, out_ref, *, in_rows, hidden_dim,
                       output_dim):
    f32 = jnp.float32
    bf16 = jnp.bfloat16
    H = hidden_dim
    P = b_ref.shape[1]                   # padded width (128)
    Bt = x_ref.shape[0]                  # batch rows in this block

    x = x_ref[...].astype(bf16)          # (Bt, in_rows) bf16 (zero-padded cols)
    bias = b_ref[...]                    # (8, P) f32; rows 0..4 used

    def layer(h_bf16, row_start, row_len, bias_idx):
        w = w_ref[pl.ds(row_start, row_len), :]            # static aligned slice, bf16
        return (jnp.dot(h_bf16, w, preferred_element_type=f32)
                + bias[bias_idx:bias_idx + 1, :])

    # trunk: relu(l1), relu(l2)
    h = jnp.maximum(layer(x, 0, in_rows, 0), 0.0)                 # (Bt, P) f32
    h = jnp.maximum(layer(h.astype(bf16), in_rows, P, 1), 0.0)    # (Bt, P) f32

    # fused heads: cols [0:H] = l2_2 / l3_2 trunk, cols [H:H+2] = l2_1 / l3_1 gate
    s2 = layer(h.astype(bf16), in_rows + P, P, 2)
    h = jnp.tanh(s2)      # tanh on gate/pad cols is harmless: next W rows are zero
    s3 = layer(h.astype(bf16), in_rows + 2 * P, P, 3)
    h = jnp.tanh(s3)
    z = layer(h.astype(bf16), in_rows + 3 * P, P, 4)   # l4 logits in cols [0:output_dim]

    # (1, P) column index / masks — broadcast against (Bt, P) values in where().
    col = jax.lax.broadcasted_iota(jnp.int32, (1, P), 1)
    gate_cols = (col >= H) & (col < H + 2)
    out_cols = col < output_dim
    col_f = col.astype(f32)

    # Gates: sigmoid(v) > 0.5  <=>  v > 0.  Single masked lane-max over
    # max(s2, s3) covers both gate heads.
    # TODO(synk): PyTorch's `if a1[i] > 0.5` on a 2-element row is ambiguous
    # (raises in eager torch); interpreted here as "any element > 0.5".
    gm = jnp.max(jnp.where(gate_cols, jnp.maximum(s2, s3), -jnp.inf),
                 axis=1, keepdims=True)                    # (Bt, 1)
    gated = gm > 0.0

    # argmax over raw logits (softmax dropped — argmax-invariant), first match.
    zm = jnp.where(out_cols, z, -jnp.inf)
    row_max = jnp.max(zm, axis=1, keepdims=True)
    amax = jnp.min(jnp.where(zm >= row_max, col_f, f32(P)),
                   axis=1, keepdims=True)                  # (Bt, 1) float index

    action = jnp.where(gated, f32(3.0), amax)              # (Bt, 1) float32
    out_ref[...] = action.astype(jnp.int32)                # sublane-dense store


def network_forward(x, packed):
    """x: (B, input_dim) float32; packed: (w_slab, b_slab, (in, hidden, out))."""
    w_slab, b_slab, (input_dim, hidden_dim, output_dim) = packed
    B = x.shape[0]
    in_rows = w_slab.shape[0] - 4 * _PAD
    if in_rows != input_dim:
        # zero-pad feature columns to the packed/aligned width (zero W rows there)
        x = jnp.pad(x, ((0, 0), (0, in_rows - input_dim)))

    # Batch tiling: single block for tiny B; otherwise >=2 blocks (v7x megacore)
    # capped at 2048 rows (per-step overhead amortized, VMEM still tiny).
    if B <= 128:
        block_b = B
    else:
        block_b = min(2048, _round8(pl.cdiv(B, 2)))
    grid = (pl.cdiv(B, block_b),)

    kernel = functools.partial(_mlp_action_kernel, in_rows=in_rows,
                               hidden_dim=hidden_dim, output_dim=output_dim)

    out = pl.pallas_call(
        kernel,
        out_shape=jax.ShapeDtypeStruct((B, 1), jnp.int32),
        grid=grid,
        in_specs=[
            pl.BlockSpec((block_b, in_rows), lambda i: (i, 0)),   # batch tile
            pl.BlockSpec(w_slab.shape, lambda i: (0, 0)),         # resident W (bf16)
            pl.BlockSpec(b_slab.shape, lambda i: (0, 0)),         # resident b (f32)
        ],
        out_specs=pl.BlockSpec((block_b, 1), lambda i: (i, 0)),
        compiler_params=pltpu.CompilerParams(
            dimension_semantics=("parallel",),       # megacore split on v7x
            vmem_limit_bytes=32 * 1024 * 1024),      # headroom on v5e's 16 MiB default
    )(x, w_slab, b_slab)
    return out[:, 0]  # (B,) int32 actions


# ------------- deterministic init (orthogonal W, zero bias) + packing -------------

def _orthogonal(key, out_dim, in_dim):
    """Mimic nn.init.orthogonal_ on a (out_dim, in_dim) weight."""
    rows, cols = out_dim, in_dim
    a = jax.random.normal(key, (max(rows, cols), min(rows, cols)), dtype=jnp.float32)
    q, r = jnp.linalg.qr(a)
    q = q * jnp.sign(jnp.diagonal(r))
    if rows < cols:
        q = q.T
    return q[:rows, :cols]


def init_params(key, input_dim, hidden_dim, output_dim):
    """Per-layer (W, b) in PyTorch layout: W (out, in), b (out,)."""
    shapes = [
        (hidden_dim, input_dim),    # l1
        (hidden_dim, hidden_dim),   # l2
        (2, hidden_dim),            # l2_1
        (hidden_dim, hidden_dim),   # l2_2
        (2, hidden_dim),            # l3_1
        (hidden_dim, hidden_dim),   # l3_2
        (output_dim, hidden_dim),   # l4
    ]
    keys = jax.random.split(key, len(shapes))
    return [(_orthogonal(k, o, i), jnp.zeros((o,), jnp.float32))
            for k, (o, i) in zip(keys, shapes)]


def pack_params(params, input_dim, hidden_dim, output_dim, pad=_PAD):
    """Pack the 7 Linear layers into one bf16 weight slab + one f32 bias slab."""
    assert hidden_dim + 2 <= pad and output_dim <= pad
    (w1, b1), (w2, b2), (w21, b21), (w22, b22), (w31, b31), (w32, b32), (w4, b4) = params
    P = pad
    in_rows = _round16(input_dim)

    def wblock(w_t, rows):
        blk = jnp.zeros((rows, P), jnp.float32)
        return blk.at[:w_t.shape[0], :w_t.shape[1]].set(w_t)

    w_slab = jnp.concatenate([
        wblock(w1.T, in_rows),                                   # l1
        wblock(w2.T, P),                                         # l2
        wblock(jnp.concatenate([w22.T, w21.T], axis=1), P),      # [l2_2 | l2_1]
        wblock(jnp.concatenate([w32.T, w31.T], axis=1), P),      # [l3_2 | l3_1]
        wblock(w4.T, P),                                         # l4
    ], axis=0).astype(jnp.bfloat16)                              # (in_rows + 4P, P)

    def brow(b):
        row = jnp.zeros((P,), jnp.float32)
        return row.at[:b.shape[0]].set(b)

    b_slab = jnp.stack([
        brow(b1), brow(b2),
        brow(jnp.concatenate([b22, b21])),
        brow(jnp.concatenate([b32, b31])),
        brow(b4),
        jnp.zeros((P,), jnp.float32),
        jnp.zeros((P,), jnp.float32),
        jnp.zeros((P,), jnp.float32),
    ], axis=0)                                                   # (8, P) f32

    return w_slab, b_slab, (input_dim, hidden_dim, output_dim)


if __name__ == "__main__":
    key = jax.random.PRNGKey(0)
    k_param, k_x = jax.random.split(key)

    # layer_num is unused by the forward pass; pick small, forward-consistent sizes.
    batch, input_dim, hidden_dim, output_dim = 8, 16, 32, 4

    params = init_params(k_param, input_dim, hidden_dim, output_dim)
    packed = pack_params(params, input_dim, hidden_dim, output_dim)
    x = jax.random.normal(k_x, (batch, input_dim), dtype=jnp.float32)

    actions = network_forward(x, packed)
    jax.block_until_ready(actions)
    assert actions.shape == (batch,) and actions.dtype == jnp.int32
    assert bool(jnp.all((actions >= 0) & (actions < max(output_dim, 4))))
    print("KERNEL_OK")
</pallas_src>

<mosaic_0001>
module attributes {stable_mosaic.version = 11 : i64} {
  func.func @_mlp_action_kernel(%arg0: i32, %arg1: memref<8x16xf32, #tpu.memory_space<vmem>>, %arg2: memref<528x128xbf16, #tpu.memory_space<vmem>>, %arg3: memref<8x128xf32, #tpu.memory_space<vmem>>, %arg4: memref<8x1xi32, #tpu.memory_space<vmem>>) attributes {dimension_semantics = [#tpu.dimension_semantics<parallel>], iteration_bounds = array<i64: 1>, scalar_prefetch = 0 : i64, scratch_operands = 0 : i64, tpu.core_type = #tpu.core_type<tc>, window_params = [{transform_indices = @transform_0, window_bounds = array<i64: 8, 16>}, {pipeline_mode = #tpu.pipeline_mode<synchronous>, transform_indices = @transform_1, window_bounds = array<i64: 528, 128>}, {pipeline_mode = #tpu.pipeline_mode<synchronous>, transform_indices = @transform_2, window_bounds = array<i64: 8, 128>}, {transform_indices = @transform_3, window_bounds = array<i64: 8, 1>}]} {
    %c0 = arith.constant 0 : index
    %c0_0 = arith.constant 0 : index
    %0 = vector.load %arg1[%c0, %c0_0] : memref<8x16xf32, #tpu.memory_space<vmem>>, vector<8x16xf32>
    %1 = arith.truncf %0 : vector<8x16xf32> to vector<8x16xbf16>
    %c0_1 = arith.constant 0 : index
    %c0_2 = arith.constant 0 : index
    %2 = vector.load %arg3[%c0_1, %c0_2] : memref<8x128xf32, #tpu.memory_space<vmem>>, vector<8x128xf32>
    %c0_3 = arith.constant 0 : index
    %c0_4 = arith.constant 0 : index
    %3 = vector.load %arg2[%c0_3, %c0_4] : memref<528x128xbf16, #tpu.memory_space<vmem>>, vector<16x128xbf16>
    %cst = arith.constant dense<0.000000e+00> : vector<8x128xf32>
    %4 = tpu.matmul %1, %3, %cst {dimension_numbers = #tpu.dot_dimension_numbers<[1], [0], [0], [1], [0, 0, 1, 1], [], []>} : vector<8x16xbf16>, vector<16x128xbf16>, vector<8x128xf32> -> vector<8x128xf32>
    %5 = vector.extract_strided_slice %2 {offsets = [0, 0], sizes = [1, 128], strides = [1, 1]} : vector<8x128xf32> to vector<1x128xf32>
    %6 = vector.broadcast %5 : vector<1x128xf32> to vector<8x128xf32>
    %7 = arith.addf %4, %6 : vector<8x128xf32>
    %cst_5 = arith.constant 0.000000e+00 : f32
    %8 = vector.broadcast %cst_5 : f32 to vector<8x128xf32>
    %9 = arith.maximumf %7, %8 : vector<8x128xf32>
    %10 = arith.truncf %9 : vector<8x128xf32> to vector<8x128xbf16>
    %c16 = arith.constant 16 : index
    %c0_6 = arith.constant 0 : index
    %11 = vector.load %arg2[%c16, %c0_6] : memref<528x128xbf16, #tpu.memory_space<vmem>>, vector<128x128xbf16>
    %cst_7 = arith.constant dense<0.000000e+00> : vector<8x128xf32>
    %12 = tpu.matmul %10, %11, %cst_7 {dimension_numbers = #tpu.dot_dimension_numbers<[1], [0], [0], [1], [0, 0, 1, 1], [], []>} : vector<8x128xbf16>, vector<128x128xbf16>, vector<8x128xf32> -> vector<8x128xf32>
    %13 = vector.extract_strided_slice %2 {offsets = [1, 0], sizes = [1, 128], strides = [1, 1]} : vector<8x128xf32> to vector<1x128xf32>
    %14 = vector.broadcast %13 : vector<1x128xf32> to vector<8x128xf32>
    %15 = arith.addf %12, %14 : vector<8x128xf32>
    %cst_8 = arith.constant 0.000000e+00 : f32
    %16 = vector.broadcast %cst_8 : f32 to vector<8x128xf32>
    %17 = arith.maximumf %15, %16 : vector<8x128xf32>
    %18 = arith.truncf %17 : vector<8x128xf32> to vector<8x128xbf16>
    %c144 = arith.constant 144 : index
    %c0_9 = arith.constant 0 : index
    %19 = vector.load %arg2[%c144, %c0_9] : memref<528x128xbf16, #tpu.memory_space<vmem>>, vector<128x128xbf16>
    %cst_10 = arith.constant dense<0.000000e+00> : vector<8x128xf32>
    %20 = tpu.matmul %18, %19, %cst_10 {dimension_numbers = #tpu.dot_dimension_numbers<[1], [0], [0], [1], [0, 0, 1, 1], [], []>} : vector<8x128xbf16>, vector<128x128xbf16>, vector<8x128xf32> -> vector<8x128xf32>
    %21 = vector.extract_strided_slice %2 {offsets = [2, 0], sizes = [1, 128], strides = [1, 1]} : vector<8x128xf32> to vector<1x128xf32>
    %22 = vector.broadcast %21 : vector<1x128xf32> to vector<8x128xf32>
    %23 = arith.addf %20, %22 : vector<8x128xf32>
    %24 = math.tanh %23 : vector<8x128xf32>
    %25 = arith.truncf %24 : vector<8x128xf32> to vector<8x128xbf16>
    %c272 = arith.constant 272 : index
    %c0_11 = arith.constant 0 : index
    %26 = vector.load %arg2[%c272, %c0_11] : memref<528x128xbf16, #tpu.memory_space<vmem>>, vector<128x128xbf16>
    %cst_12 = arith.constant dense<0.000000e+00> : vector<8x128xf32>
    %27 = tpu.matmul %25, %26, %cst_12 {dimension_numbers = #tpu.dot_dimension_numbers<[1], [0], [0], [1], [0, 0, 1, 1], [], []>} : vector<8x128xbf16>, vector<128x128xbf16>, vector<8x128xf32> -> vector<8x128xf32>
    %28 = vector.extract_strided_slice %2 {offsets = [3, 0], sizes = [1, 128], strides = [1, 1]} : vector<8x128xf32> to vector<1x128xf32>
    %29 = vector.broadcast %28 : vector<1x128xf32> to vector<8x128xf32>
    %30 = arith.addf %27, %29 : vector<8x128xf32>
    %31 = math.tanh %30 : vector<8x128xf32>
    %32 = arith.truncf %31 : vector<8x128xf32> to vector<8x128xbf16>
    %c400 = arith.constant 400 : index
    %c0_13 = arith.constant 0 : index
    %33 = vector.load %arg2[%c400, %c0_13] : memref<528x128xbf16, #tpu.memory_space<vmem>>, vector<128x128xbf16>
    %cst_14 = arith.constant dense<0.000000e+00> : vector<8x128xf32>
    %34 = tpu.matmul %32, %33, %cst_14 {dimension_numbers = #tpu.dot_dimension_numbers<[1], [0], [0], [1], [0, 0, 1, 1], [], []>} : vector<8x128xbf16>, vector<128x128xbf16>, vector<8x128xf32> -> vector<8x128xf32>
    %35 = vector.extract_strided_slice %2 {offsets = [4, 0], sizes = [1, 128], strides = [1, 1]} : vector<8x128xf32> to vector<1x128xf32>
    %36 = vector.broadcast %35 : vector<1x128xf32> to vector<8x128xf32>
    %37 = arith.addf %34, %36 : vector<8x128xf32>
    %38 = tpu.iota {dimensions = array<i32: 1>} : vector<1x128xi32>
    %c32_i32 = arith.constant 32 : i32
    %39 = vector.broadcast %c32_i32 : i32 to vector<1x128xi32>
    %40 = arith.cmpi sge, %38, %39 : vector<1x128xi32>
    %c34_i32 = arith.constant 34 : i32
    %41 = vector.broadcast %c34_i32 : i32 to vector<1x128xi32>
    %42 = arith.cmpi slt, %38, %41 : vector<1x128xi32>
    %43 = arith.andi %40, %42 : vector<1x128xi1>
    %c4_i32 = arith.constant 4 : i32
    %44 = vector.broadcast %c4_i32 : i32 to vector<1x128xi32>
    %45 = arith.cmpi slt, %38, %44 : vector<1x128xi32>
    %46 = arith.sitofp %38 : vector<1x128xi32> to vector<1x128xf32>
    %47 = arith.maximumf %23, %30 : vector<8x128xf32>
    %cst_15 = arith.constant 0xFF800000 : f32
    %48 = vector.shape_cast %43 : vector<1x128xi1> to vector<1x128xi1>
    %49 = vector.broadcast %48 : vector<1x128xi1> to vector<8x128xi1>
    %50 = vector.broadcast %cst_15 : f32 to vector<8x128xf32>
    %51 = arith.select %49, %47, %50 : vector<8x128xi1>, vector<8x128xf32>
    %cst_16 = arith.constant dense<0xFF800000> : vector<8xf32>
    %52 = vector.multi_reduction <maximumf>, %51, %cst_16 [1] : vector<8x128xf32> to vector<8xf32>
    %53 = vector.shape_cast %52 : vector<8xf32> to vector<8x1xf32>
    %cst_17 = arith.constant 0.000000e+00 : f32
    %54 = vector.broadcast %cst_17 : f32 to vector<8x1xf32>
    %55 = arith.cmpf ogt, %53, %54 : vector<8x1xf32>
    %cst_18 = arith.constant 0xFF800000 : f32
    %56 = vector.shape_cast %45 : vector<1x128xi1> to vector<1x128xi1>
    %57 = vector.broadcast %56 : vector<1x128xi1> to vector<8x128xi1>
    %58 = vector.broadcast %cst_18 : f32 to vector<8x128xf32>
    %59 = arith.select %57, %37, %58 : vector<8x128xi1>, vector<8x128xf32>
    %cst_19 = arith.constant dense<0xFF800000> : vector<8xf32>
    %60 = vector.multi_reduction <maximumf>, %59, %cst_19 [1] : vector<8x128xf32> to vector<8xf32>
    %61 = vector.shape_cast %60 : vector<8xf32> to vector<8x1xf32>
    %62 = vector.broadcast %61 : vector<8x1xf32> to vector<8x128xf32>
    %63 = arith.cmpf oge, %59, %62 : vector<8x128xf32>
    %cst_20 = arith.constant 1.280000e+02 : f32
    %64 = vector.shape_cast %46 : vector<1x128xf32> to vector<1x128xf32>
    %65 = vector.broadcast %64 : vector<1x128xf32> to vector<8x128xf32>
    %66 = vector.broadcast %cst_20 : f32 to vector<8x128xf32>
    %67 = arith.select %63, %65, %66 : vector<8x128xi1>, vector<8x128xf32>
    %cst_21 = arith.constant dense<0x7F800000> : vector<8xf32>
    %68 = vector.multi_reduction <minimumf>, %67, %cst_21 [1] : vector<8x128xf32> to vector<8xf32>
    %69 = vector.shape_cast %68 : vector<8xf32> to vector<8x1xf32>
    %cst_22 = arith.constant 3.000000e+00 : f32
    %70 = vector.broadcast %cst_22 : f32 to vector<8x1xf32>
    %71 = arith.select %55, %70, %69 : vector<8x1xi1>, vector<8x1xf32>
    %72 = arith.fptosi %71 : vector<8x1xf32> to vector<8x1xi32>
    %c0_23 = arith.constant 0 : index
    %c0_24 = arith.constant 0 : index
    %73 = vector.load %arg4[%c0_23, %c0_24] : memref<8x1xi32, #tpu.memory_space<vmem>>, vector<8x1xi32>
    tpu.vector_store %arg4[%c0_23, %c0_24], %72 {strides = array<i32>} : memref<8x1xi32, #tpu.memory_space<vmem>>, vector<8x1xi32>,
    return
  }
  func.func @transform_0(%arg0: i32) -> (i32, i32) {
    %c0_i32 = arith.constant 0 : i32
    %c0_i32_0 = arith.constant 0 : i32
    return %arg0, %c0_i32 : i32, i32
  }
  func.func @transform_1(%arg0: i32) -> (i32, i32) {
    %c0_i32 = arith.constant 0 : i32
    %c0_i32_0 = arith.constant 0 : i32
    %c0_i32_1 = arith.constant 0 : i32
    return %c0_i32, %c0_i32_0 : i32, i32
  }
  func.func @transform_2(%arg0: i32) -> (i32, i32) {
    %c0_i32 = arith.constant 0 : i32
    %c0_i32_0 = arith.constant 0 : i32
    %c0_i32_1 = arith.constant 0 : i32
    return %c0_i32, %c0_i32_0 : i32, i32
  }
  func.func @transform_3(%arg0: i32) -> (i32, i32) {
    %c0_i32 = arith.constant 0 : i32
    %c0_i32_0 = arith.constant 0 : i32
    return %arg0, %c0_i32 : i32, i32
  }
}

</mosaic_0001>

<bundles_post_ra>
// kernel: tpu_custom_call.1
= control target key start
LH: loop header
LB: loop body
LE: loop exit
PB: predicated region body
PF: predicated region fallthrough
CT: control target
= control target key end

     0   :  { %8 = vsyncpa [#allocation3], 0  ;;  %s950_s0 = inlined_call_operand.hbm [shape: f32[8,16], index: 0, kind: input, shape index: {}]   ;;  %s951_s1 = inlined_call_operand.hbm [shape: bf16[528,128], index: 1, kind: input, shape index: {}]   ;;  %s952_s2 = inlined_call_operand.hbm [shape: f32[8,128], index: 2, kind: input, shape index: {}]   ;;  %s953_s3 = inlined_call_operand.vmem [shape: s32[8,1], index: 3, kind: output, shape index: {}]  }
   0x1   :  { %9 = vsyncpa [#allocation5], 0  ;;  %s852_s12 = smov [#allocation4]  }
   0x2   :  { %s25_s13 = sshll.u32 %s852_s12, 4  ;;  %s26_s13 = int_to_ptr.vmem [resolvable:$true] %s25_s13 }
   0x3   :  { %s796_s14 = scalar_lea.vmem %s26_s13, 4224  ;;  %p801_p1 = scmp.lt.s32.totalorder %s26_s13, %s26_s13 }
   0x4   :  { %p797_p0 = scmp.ne.s32.totalorder %s26_s13, %s796_s14  ;;  %p802_p2 = scmp.lt.s32.totalorder %s796_s14, %s796_s14 }
   0x6   :  { %p803_p3 = por %p802_p2, %p801_p1 }
   0x8   :  { %p804_p4 = pnand %p803_p3, %p797_p0 }
   0xa   :  { %807 = shalt.err (!%p804_p4)
}
   0xb   :  { %s853_s15 = smov 64   ;;  %s854_s16 = smov 4  }
   0xc   :  { %31 = dma.hbm_to_vmem [thread:$0]  %s951_s1, 4224, %s26_s13, [#allocation5], %s853_s15, %s853_s15, %s854_s16  }
   0xd   :  { %s855_s19 = smov [#allocation2]   ;;  %s856_s21 = smov [#allocation6]  }
   0xe   :  { %s16_s20 = sshll.u32 %s855_s19, 4  ;;  %s38_s22 = sshll.u32 %s856_s21, 4  ;;  %s17_s20 = int_to_ptr.vmem [resolvable:$true] %s16_s20  ;;  %s39_s22 = int_to_ptr.vmem [resolvable:$true] %s38_s22 }
   0xf   :  { %s816_s23 = scalar_lea.vmem %s17_s20, 128  ;;  %p821_p6 = scmp.lt.s32.totalorder %s17_s20, %s17_s20 }
  0x10   :  { %p817_p5 = scmp.ne.s32.totalorder %s17_s20, %s816_s23  ;;  %p822_p7 = scmp.lt.s32.totalorder %s816_s23, %s816_s23 }
  0x12   :  { %p823_p8 = por %p822_p7, %p821_p6 }
  0x14   :  { %p824_p9 = pnand %p823_p8, %p817_p5 }
  0x16   :  { %827 = shalt.err (!%p824_p9)
}
  0x17   :  { %19 = dma.hbm_to_vmem [thread:$0]  %s950_s0, 128, %s17_s20, [#allocation3]  }
  0x18   :  { %s836_s26 = scalar_lea.vmem %s39_s22, 128  ;;  %p841_p11 = scmp.lt.s32.totalorder %s39_s22, %s39_s22 }
  0x19   :  { %p837_p10 = scmp.ne.s32.totalorder %s39_s22, %s836_s26  ;;  %p842_p12 = scmp.lt.s32.totalorder %s836_s26, %s836_s26 }
  0x1b   :  { %p843_p13 = por %p842_p12, %p841_p11 }
  0x1d   :  { %p844_p0 = pnand %p843_p13, %p837_p10 }
  0x1f   :  { %847 = shalt.err (!%p844_p0)
}
  0x20   :  { %41 = dma.hbm_to_vmem [thread:$0]  %s952_s2, 128, %s39_s22, [#allocation5]  }
  0x21   :  { %848 = dma.done.wait [#allocation3], 128  }
  0x22   :  { %849 = vsyncadd [#allocation3], 4294967168 }
  0x23   :  { %850 = dma.done.wait [#allocation5], 4352  }
  0x24   :  { %851 = vsyncadd [#allocation5], 4294962944  ;;  %v857_v0 = vmov 0.0   ;;  %vm858_vm0 = vmmov 0   ;;  %v751_v1 = vld [vmem:[#allocation4] sm:$0xff]   ;;  %v52_v2 = vld [vmem:[#allocation2] sm:$0xff]  ;;  %v57_v18 = vlaneseq }
  0x25   :  { %656 = vmatprep.subr.bf16.mxu0 %v857_v0  ;;  %658 = vmatprep.mubr.msk.bf16.mxu0 %vm858_vm0, %v857_v0  ;;  %v53_v3 = vpack.c.bf16 %v52_v2, %v52_v2  ;;  %vm67_vm1 = vcmask 130048   ;;  %v752_v4 = vld [vmem:[#allocation4 + $0x40] sm:$0xff]   ;;  %v753_v5 = vld [vmem:[#allocation4 + $0x38] sm:$0xff]   ;;  %v754_v6 = vld [vmem:[#allocation4 + $0x30] sm:$0xff]   ;;  %vm576_vm8 = vcmask 7168  }
  0x26   :  { %662 = vmatprep.subr.bf16.mxu1 %v857_v0  ;;  %678 = vmatprep.mubr.msk.bf16.mxu1 %vm858_vm0, %v857_v0  ;;  %v755_v7 = vld [vmem:[#allocation4 + $0x28] sm:$0xff]   ;;  %v756_v8 = vld [vmem:[#allocation4 + $0x20] sm:$0xff]   ;;  %v757_v9 = vld [vmem:[#allocation4 + $0x18] sm:$0xff]   ;;  %v912_v19 = vshrl.u32 %v57_v18, 7 }
  0x27   :  { %657 = vmatpush3.bf16.msra.mxu0 %v751_v1  ;;  %663 = vmatpush3.bf16.msra.mxu1 %v752_v4  ;;  %v758_v10 = vld [vmem:[#allocation4 + $0x10] sm:$0xff]   ;;  %v759_v11 = vld [vmem:[#allocation4 + $0x8] sm:$0xff]   ;;  %v760_v12 = vld [vmem:[#allocation4 + $0x80] sm:$0xff]  }
  0x28   :  { %682 = vmatprep.subr.bf16.mxu0 %v857_v0  ;;  %664 = vmatprep.subr.bf16.mxu1 %v857_v0  ;;  %v761_v13 = vld [vmem:[#allocation4 + $0x78] sm:$0xff]   ;;  %v762_v14 = vld [vmem:[#allocation4 + $0x70] sm:$0xff]   ;;  %v763_v15 = vld [vmem:[#allocation4 + $0x68] sm:$0xff]   ;;  %v59_v20 = vsub.s32 0, %v912_v19  ;;  %v131_v35 = vsub.s32 1, %v912_v19  ;;  %v241_v52 = vsub.s32 2, %v912_v19 }
  0x29   :  { %v764_v16 = vld [vmem:[#allocation4 + $0x60] sm:$0xff]   ;;  %v765_v17 = vld [vmem:[#allocation4 + $0x58] sm:$0xff]   ;;  %v915_v21 = vld [vmem:[#allocation6] sm:$0xff] }
  0x2a   :  { %659 = vmatmul.mubr.msk.bf16.vlgmr.msra.gmra.mxu0 %vm67_vm1, %v53_v3  ;;  %v60_v22 = vrot.slane %v915_v21, %v59_v20  ;;  %v766_v30 = vld [vmem:[#allocation4 + $0x50] sm:$0xff]   ;;  %v767_v31 = vld [vmem:[#allocation4 + $0x48] sm:$0xff]   ;;  %v768_v32 = vld [vmem:[#allocation4 + $0xc0] sm:$0xff]   ;;  %v132_v36 = vrot.slane %v915_v21, %v131_v35  ;;  %v242_v53 = vrot.slane %v915_v21, %v241_v52  ;;  %v351_v3 = vsub.s32 3, %v912_v19 }
  0x2b   :  { %698 = vmatprep.mubr.msk.bf16.mxu0 %vm858_vm0, %v857_v0  ;;  %665 = vmatpush3.bf16.msra.mxu1 %v753_v5  ;;  %v769_v33 = vld [vmem:[#allocation4 + $0xb8] sm:$0xff]   ;;  %v770_v34 = vld [vmem:[#allocation4 + $0xb0] sm:$0xff]   ;;  %v771_v44 = vld [vmem:[#allocation4 + $0xa8] sm:$0xff]  }
  0x2c   :  { %666 = vmatprep.subr.bf16.mxu1 %v857_v0  ;;  %683 = vmatpush3.bf16.msra.mxu0 %v760_v12  ;;  %v772_v45 = vld [vmem:[#allocation4 + $0xa0] sm:$0xff]   ;;  %v773_v46 = vld [vmem:[#allocation4 + $0x98] sm:$0xff]   ;;  %v774_v47 = vld [vmem:[#allocation4 + $0x90] sm:$0xff]   ;;  %v352_v4 = vrot.slane %v915_v21, %v351_v3  ;;  %v461_v12 = vsub.s32 4, %v912_v19 }
  0x2d   :  { %684 = vmatprep.subr.bf16.mxu0 %v857_v0  ;;  %v775_v48 = vld [vmem:[#allocation4 + $0x88] sm:$0xff]   ;;  %v776_v49 = vld [vmem:[#allocation4 + $0x100] sm:$0xff]   ;;  %v777_v50 = vld [vmem:[#allocation4 + $0xf8] sm:$0xff]  }
  0x2e   :  { %v778_v51 = vld [vmem:[#allocation4 + $0xf0] sm:$0xff]   ;;  %v779_v61 = vld [vmem:[#allocation4 + $0xe8] sm:$0xff]   ;;  %v780_v62 = vld [vmem:[#allocation4 + $0xe0] sm:$0xff]  }
  0x2f   :  { %667 = vmatpush3.bf16.msra.mxu1 %v754_v6  ;;  %v781_v63 = vld [vmem:[#allocation4 + $0xd8] sm:$0xff]   ;;  %v782_v1 = vld [vmem:[#allocation4 + $0xd0] sm:$0xff]   ;;  %v783_v2 = vld [vmem:[#allocation4 + $0xc8] sm:$0xff]  }
  0x30   :  { %668 = vmatprep.subr.bf16.mxu1 %v857_v0  ;;  %685 = vmatpush3.bf16.msra.mxu0 %v761_v13  ;;  %v462_v13 = vrot.slane %v915_v21, %v461_v12 }
  0x31   :  { %686 = vmatprep.subr.bf16.mxu0 %v857_v0 }
  0x33   :  { %669 = vmatpush3.bf16.msra.mxu1 %v755_v7 }
  0x34   :  { %670 = vmatprep.subr.bf16.mxu1 %v857_v0  ;;  %687 = vmatpush3.bf16.msra.mxu0 %v762_v14 }
  0x35   :  { %688 = vmatprep.subr.bf16.mxu0 %v857_v0 }
  0x37   :  { %671 = vmatpush3.bf16.msra.mxu1 %v756_v8 }
  0x38   :  { %672 = vmatprep.subr.bf16.mxu1 %v857_v0  ;;  %689 = vmatpush3.bf16.msra.mxu0 %v763_v15 }
  0x39   :  { %690 = vmatprep.subr.bf16.mxu0 %v857_v0 }
  0x3b   :  { %673 = vmatpush3.bf16.msra.mxu1 %v757_v9 }
  0x3c   :  { %674 = vmatprep.subr.bf16.mxu1 %v857_v0  ;;  %691 = vmatpush3.bf16.msra.mxu0 %v764_v16 }
  0x3d   :  { %692 = vmatprep.subr.bf16.mxu0 %v857_v0 }
  0x3f   :  { %675 = vmatpush3.bf16.msra.mxu1 %v758_v10 }
  0x40   :  { %676 = vmatprep.subr.bf16.mxu1 %v857_v0  ;;  %693 = vmatpush3.bf16.msra.mxu0 %v765_v17 }
  0x41   :  { %694 = vmatprep.subr.bf16.mxu0 %v857_v0 }
  0x43   :  { %677 = vmatpush3.bf16.msra.mxu1 %v759_v11 }
  0x44   :  { %702 = vmatprep.subr.bf16.mxu1 %v857_v0  ;;  %695 = vmatpush3.bf16.msra.mxu0 %v766_v30 }
  0x45   :  { %696 = vmatprep.subr.bf16.mxu0 %v857_v0 }
  0x48   :  { %697 = vmatpush3.bf16.msra.mxu0 %v767_v31 }
  0x49   :  { %722 = vmatprep.subr.bf16.mxu0 %v857_v0 }
  0xea   :  { %v105_v23 = vpop.f32.mrf.mxu0 }
  0xeb   :  { %v106_v24 = vadd.f32 %v105_v23, %v60_v22 }
  0xec   :  { %v660_v25 = vpop.f32.mrf.mxu0 }
  0xed   :  { %v111_v26 = vmax.f32 %v106_v24, 0.0 }
  0xee   :  { %v108_v27 = vpop.f32.mrf.mxu0 }
  0xef   :  { %v112_v28 = vpack.c.bf16 %v111_v26, %v111_v26 }
  0xf0   :  { %v661_v29 = vpop.f32.mrf.mxu0 }
  0xf1   :  { %679 = vmatmul.mubr.bf16.vlgmr.msra.gmra.mxu1 %v112_v28 }
  0xf2   :  { %718 = vmatprep.mubr.msk.bf16.mxu1 %vm858_vm0, %v857_v0  ;;  %703 = vmatpush3.bf16.msra.mxu1 %v768_v32 }
  0xf3   :  { %704 = vmatprep.subr.bf16.mxu1 %v857_v0 }
  0xf6   :  { %705 = vmatpush3.bf16.msra.mxu1 %v769_v33 }
  0xf7   :  { %706 = vmatprep.subr.bf16.mxu1 %v857_v0 }
  0xfa   :  { %707 = vmatpush3.bf16.msra.mxu1 %v770_v34 }
  0xfb   :  { %708 = vmatprep.subr.bf16.mxu1 %v857_v0 }
  0xfe   :  { %709 = vmatpush3.bf16.msra.mxu1 %v771_v44 }
  0xff   :  { %710 = vmatprep.subr.bf16.mxu1 %v857_v0 }
 0x102   :  { %711 = vmatpush3.bf16.msra.mxu1 %v772_v45 }
 0x103   :  { %712 = vmatprep.subr.bf16.mxu1 %v857_v0 }
 0x106   :  { %713 = vmatpush3.bf16.msra.mxu1 %v773_v46 }
 0x107   :  { %714 = vmatprep.subr.bf16.mxu1 %v857_v0 }
 0x10a   :  { %715 = vmatpush3.bf16.msra.mxu1 %v774_v47 }
 0x10b   :  { %716 = vmatprep.subr.bf16.mxu1 %v857_v0 }
 0x10e   :  { %717 = vmatpush3.bf16.msra.mxu1 %v775_v48 }
 0x1b1   :  { %v215_v37 = vpop.f32.mrf.mxu1 }
 0x1b2   :  { %v216_v38 = vadd.f32 %v215_v37, %v132_v36 }
 0x1b3   :  { %v680_v39 = vpop.f32.mrf.mxu1 }
 0x1b4   :  { %v221_v40 = vmax.f32 %v216_v38, 0.0 }
 0x1b5   :  { %v218_v41 = vpop.f32.mrf.mxu1 }
 0x1b6   :  { %v222_v42 = vpack.c.bf16 %v221_v40, %v221_v40 }
 0x1b7   :  { %v681_v43 = vpop.f32.mrf.mxu1 }
 0x1b8   :  { %699 = vmatmul.mubr.bf16.vlgmr.msra.gmra.mxu0 %v222_v42 }
 0x1b9   :  { %738 = vmatprep.mubr.msk.bf16.mxu0 %vm858_vm0, %v857_v0  ;;  %723 = vmatpush3.bf16.msra.mxu0 %v776_v49 }
 0x1ba   :  { %724 = vmatprep.subr.bf16.mxu0 %v857_v0 }
 0x1bd   :  { %725 = vmatpush3.bf16.msra.mxu0 %v777_v50 }
 0x1be   :  { %726 = vmatprep.subr.bf16.mxu0 %v857_v0 }
 0x1c1   :  { %727 = vmatpush3.bf16.msra.mxu0 %v778_v51 }
 0x1c2   :  { %728 = vmatprep.subr.bf16.mxu0 %v857_v0 }
 0x1c5   :  { %729 = vmatpush3.bf16.msra.mxu0 %v779_v61 }
 0x1c6   :  { %730 = vmatprep.subr.bf16.mxu0 %v857_v0 }
 0x1c9   :  { %731 = vmatpush3.bf16.msra.mxu0 %v780_v62 }
 0x1ca   :  { %732 = vmatprep.subr.bf16.mxu0 %v857_v0 }
 0x1cd   :  { %733 = vmatpush3.bf16.msra.mxu0 %v781_v63 }
 0x1ce   :  { %734 = vmatprep.subr.bf16.mxu0 %v857_v0 }
 0x1d1   :  { %735 = vmatpush3.bf16.msra.mxu0 %v782_v1 }
 0x1d2   :  { %736 = vmatprep.subr.bf16.mxu0 %v857_v0  ;;  %v552_v0 = vand.u32 127, %v57_v18 }
 0x1d4   :  { %vm556_vm2 = vcmp.lt.s32.totalorder %v552_v0, 4  ;;  %vm553_vm3 = vcmp.ge.s32.totalorder %v552_v0, 32  ;;  %vm554_vm4 = vcmp.lt.s32.totalorder %v552_v0, 34  ;;  %v557_v25 = vcvt.s32.f32 %v552_v0 }
 0x1d5   :  { %737 = vmatpush3.bf16.msra.mxu0 %v783_v2  ;;  %vm555_vm5 = vmand %vm553_vm3, %vm554_vm4 }
 0x278   :  { %v325_v54 = vpop.f32.mrf.mxu0 }
 0x279   :  { %v326_v55 = vadd.f32 %v325_v54, %v242_v53 }
 0x27a   :  { %v700_v56 = vpop.f32.mrf.mxu0 }
 0x27b   :  { %784 = vtanh.f32 %v326_v55 }
 0x27c   :  { %v328_v57 = vpop.f32.mrf.mxu0 }
 0x27e   :  { %v701_v58 = vpop.f32.mrf.mxu0 }
 0x288   :  { %v785_v59 = vpop.eup %784 }
 0x289   :  { %v332_v60 = vpack.c.bf16 %v785_v59, %v785_v59 }
 0x28b   :  { %719 = vmatmul.mubr.bf16.vlgmr.msra.gmra.mxu1 %v332_v60 }
 0x34b   :  { %v435_v5 = vpop.f32.mrf.mxu1 }
 0x34c   :  { %v436_v6 = vadd.f32 %v435_v5, %v352_v4 }
 0x34d   :  { %v720_v7 = vpop.f32.mrf.mxu1 }
 0x34e   :  { %786 = vtanh.f32 %v436_v6  ;;  %v558_v20 = vmax.f32 %v326_v55, %v436_v6 }
 0x34f   :  { %v438_v8 = vpop.f32.mrf.mxu1 }
 0x350   :  { %v561_v24 = vsel %vm555_vm5, %v558_v20, -inf }
 0x351   :  { %v721_v9 = vpop.f32.mrf.mxu1 }
 0x35b   :  { %v787_v10 = vpop.eup %786 }
 0x35c   :  { %v442_v11 = vpack.c.bf16 %v787_v10, %v787_v10 }
 0x35e   :  { %739 = vmatmul.mubr.bf16.vlgmr.msra.gmra.mxu0 %v442_v11 }
 0x41e   :  { %v545_v14 = vpop.f32.mrf.mxu0 }
 0x41f   :  { %v546_v15 = vadd.f32 %v545_v14, %v462_v13 }
 0x420   :  { %v740_v16 = vpop.f32.mrf.mxu0 }
 0x421   :  { %v567_v17 = vsel %vm556_vm2, %v546_v15, -inf }
 0x422   :  { %568 = vmax.xlane.f32.xlu0 %v567_v17  ;;  %v548_v22 = vpop.f32.mrf.mxu0 }
 0x424   :  { %v741_v23 = vpop.f32.mrf.mxu0 }
 0x426   :  { %562 = vmax.xlane.f32.xlu0 %v561_v24 }
 0x4ab   :  { %v569_v19 = vpop.xlane.xlu0 %568 }
 0x4ac   :  { %vm570_vm6 = vcmp.ge.f32.partialorder %v567_v17, %v569_v19 }
 0x4ad   :  { %v571_v21 = vsel %vm570_vm6, %v557_v25, 128.0 }
 0x4ae   :  { %572 = vmin.xlane.f32.xlu1 %v571_v21 }
 0x4af   :  { %v563_v18 = vpop.xlane.xlu0 %562 }
 0x4b0   :  { %vm564_vm7 = vcmp.gt.f32.partialorder %v563_v18, 0.0 }
 0x537   :  { %v573_v26 = vpop.xlane.xlu1 %572 }
 0x538   :  { %v574_v27 = vsel %vm564_vm7, 3.0, %v573_v26 }
 0x539   :  { %v742_v28 = vtrunc.f32 %v574_v27 }
 0x53b   :  { %v743_v29 = vcvt.f32.s32 %v742_v28 }
 0x53d   :  { %577 = vst.msk [vmem:[%s953_s3] sm:$0xff] %vm576_vm8, %v743_v29 }
 0x53e   :  { %582 = vsyncpa [#allocation3], 1 }
 0x53f   :  { %583 = vsyncpa [#allocation5], 1 }

</bundles_post_ra>
